<compile_context>
chip_gen: v5e
topology: v5e:2x2
jax: 0.10.0
libtpu: 0.0.40
codegen_flags: <defaults>
</compile_context>

<pallas_src>
import functools

import jax
import jax.numpy as jnp
from jax.experimental import pallas as pl
from jax.experimental.pallas import tpu as pltpu  # noqa: F401  (imported for completeness)


def _cal_shape_kernel(slab_ref, w_thr_ref, w_nm1_ref, w_nn_ref, w_mn_ref, out_ref, *, kk):
    # slab_ref : (L, KKp, Cp) f32  raw skeleton values; stripe positions on sublanes
    #            (zero-padded kk -> KKp), filters on lanes (zero-padded to Cp).
    # w_thr_ref: (L, 1, Cp)  per-layer threshold, lane-replicated
    # w_nm1_ref: (L, 1, Cp)  per-layer 1/(C-1), lane-replicated
    # w_nn_ref : (L, KKp, 1) per-layer 1/(C*(C-1))
    # w_mn_ref : (L, 1, Cp)  per-layer 1/(C*KK), lane-replicated
    # out_ref  : (8, 128)    row 0, lanes 0..2 = [stripe_var, filter_var, mean] totals
    inv_kk = 1.0 / kk
    inv_kkm1 = 1.0 / (kk - 1.0)

    s = jnp.abs(slab_ref[...])
    s2 = s * s

    # Per-filter (lane) sums over stripe positions — computed once, reused by BOTH
    # variances.  Zero-padded lanes/sublanes contribute exactly 0 to every sum.
    fil_sum = jnp.sum(s, axis=1, keepdims=True)       # (L, 1, Cp)
    fil_sum2 = jnp.sum(s2, axis=1, keepdims=True)     # (L, 1, Cp)

    # stripe_var total: unbiased variance over the KK stripe positions, summed over all
    # filters of all layers.  KK is identical per layer, so divisors are global constants.
    sv = (jnp.sum(fil_sum2) - jnp.sum(fil_sum * fil_sum) * inv_kk) * inv_kkm1

    # filter_var total: per-position unbiased variance over that layer's C filters,
    # summed.  Per-layer divisors arrive as replicated weight tensors:
    #   sum_l tot_s2_l/(C_l-1)            == sum(fil_sum2 * w_nm1)
    #   sum_l sum_k pos_sum^2/(C_l(C_l-1)) == sum(pos_sum^2 * w_nn)
    pos_sum = jnp.sum(s, axis=2, keepdims=True)       # (L, KKp, 1)
    fv = jnp.sum(fil_sum2 * w_nm1_ref[...]) - jnp.sum(pos_sum * pos_sum * w_nn_ref[...])

    # Threshold-gated prunable mass, per-layer normalized by C*KK.  The (L,1,Cp)
    # threshold broadcasts across sublanes; padded zeros contribute 0 either way.
    gated = jnp.where(s < w_thr_ref[...], s, 0.0)
    mn = jnp.sum(jnp.sum(gated, axis=1, keepdims=True) * w_mn_ref[...])

    # Pack the three scalars into one (8,128) tile.  Runs once per call (not per layer),
    # so this is a negligible handful of VPU ops; avoids scalar element stores to VMEM.
    lane = jax.lax.broadcasted_iota(jnp.int32, out_ref.shape, 1)
    row0 = jax.lax.broadcasted_iota(jnp.int32, out_ref.shape, 0) == 0
    out_ref[...] = (
        jnp.where(row0 & (lane == 0), sv, 0.0)
        + jnp.where(row0 & (lane == 1), fv, 0.0)
        + jnp.where(row0 & (lane == 2), mn, 0.0)
    )


def cal_shape_forward(model_skeletons, dic_threshold):
    """Mirrors cal_shape.forward: accumulate (stripe_var, filter_var, mean) over all
    FilterStripe skeletons, skipping keys containing 'downsample'.  All layers are
    processed in ONE grid-less pallas_call on a single packed slab."""
    names = [k for k in model_skeletons if "downsample" not in k]
    if not names:
        z = jnp.float32(0.0)
        return z, z, z

    kks = {int(model_skeletons[k].shape[1]) * int(model_skeletons[k].shape[2]) for k in names}
    assert len(kks) == 1, "all FilterSkeletons must share the same spatial kernel size"
    kk = kks.pop()
    assert kk > 1, "K*K must be > 1 (unbiased variance over stripe positions)"
    chans = [int(model_skeletons[k].shape[0]) for k in names]
    assert all(c > 1 for c in chans), "each layer must have > 1 filter (unbiased variance)"

    num_layers = len(names)
    kk_pad = ((kk + 7) // 8) * 8                           # sublane-aligned stripe axis
    c_pad = max(128, ((max(chans) + 127) // 128) * 128)    # lane-dense filter axis

    # Host-side packing: one reshape+pad per layer, then a single stack + transpose.
    # TODO(synk): in a real training loop, keep the skeletons stored pre-packed in this
    #             (L, KK_pad, C_pad) layout so the wrapper does no per-layer XLA work.
    padded = [
        jnp.pad(
            model_skeletons[k].astype(jnp.float32).reshape(c, kk),
            ((0, c_pad - c), (0, kk_pad - kk)),
        )
        for k, c in zip(names, chans)
    ]
    slab = jnp.transpose(jnp.stack(padded, axis=0), (0, 2, 1))   # (L, KK_pad, C_pad)

    n_f = jnp.asarray(chans, dtype=jnp.float32)                                  # (L,)
    thr = jnp.asarray([float(dic_threshold[k]) for k in names], dtype=jnp.float32)
    inv_nm1 = 1.0 / (n_f - 1.0)
    w_thr = jnp.broadcast_to(thr[:, None, None], (num_layers, 1, c_pad))
    w_nm1 = jnp.broadcast_to(inv_nm1[:, None, None], (num_layers, 1, c_pad))
    w_nn = jnp.broadcast_to((inv_nm1 / n_f)[:, None, None], (num_layers, kk_pad, 1))
    w_mn = jnp.broadcast_to((1.0 / (n_f * float(kk)))[:, None, None], (num_layers, 1, c_pad))

    # Grid-less call: whole arrays land in VMEM as single blocks (total << VMEM on all
    # TPU generations); no per-layer grid steps, no scalar prefetch, default pipelining.
    out = pl.pallas_call(
        functools.partial(_cal_shape_kernel, kk=float(kk)),
        out_shape=jax.ShapeDtypeStruct((8, 128), jnp.float32),
    )(slab, w_thr, w_nm1, w_nn, w_mn)

    return out[0, 0], out[0, 1], out[0, 2]


if __name__ == "__main__":
    # Small synthetic "model": a few FilterStripe layers, each with a FilterSkeleton of
    # shape (out_channels, 3, 3) (resnet56 stages use 16/32/64 channels; scaled down).
    key = jax.random.PRNGKey(0)
    layer_channels = {
        "layer1.0.conv1": 8,
        "layer2.0.conv1": 16,
        "layer3.0.conv1": 32,
        "layer2.0.downsample.conv": 16,   # must be skipped by cal_shape
    }
    model_skeletons = {}
    dic_threshold = {}
    for i, (name, c_out) in enumerate(layer_channels.items()):
        sub = jax.random.fold_in(key, i)
        model_skeletons[name] = jax.random.uniform(
            sub, (c_out, 3, 3), dtype=jnp.float32, minval=0.0, maxval=1.0
        )
        dic_threshold[name] = 0.05 + 0.01 * i

    out = cal_shape_forward(model_skeletons, dic_threshold)
    out = jax.block_until_ready(out)

    # Pure-JAX reference check of the kernel math.
    ref_sv = ref_fv = ref_mn = jnp.float32(0.0)
    for name, skel in model_skeletons.items():
        if "downsample" in name:
            continue
        s = jnp.abs(skel.reshape(skel.shape[0], -1))
        ref_sv = ref_sv + jnp.sum(jnp.var(s, axis=1, ddof=1))
        ref_fv = ref_fv + jnp.sum(jnp.var(s, axis=0, ddof=1))
        ref_mn = ref_mn + jnp.sum(jnp.where(s < dic_threshold[name], s, 0.0)) / s.size

    assert jnp.allclose(out[0], ref_sv, rtol=1e-4, atol=1e-5), (out[0], ref_sv)
    assert jnp.allclose(out[1], ref_fv, rtol=1e-4, atol=1e-5), (out[1], ref_fv)
    assert jnp.allclose(out[2], ref_mn, rtol=1e-4, atol=1e-5), (out[2], ref_mn)

    print("KERNEL_OK")
</pallas_src>

<mosaic_0001>
module attributes {stable_mosaic.version = 11 : i64} {
  func.func @_cal_shape_kernel(%arg0: memref<3x16x128xf32, #tpu.memory_space<vmem>>, %arg1: memref<3x1x128xf32, #tpu.memory_space<vmem>>, %arg2: memref<3x1x128xf32, #tpu.memory_space<vmem>>, %arg3: memref<3x16x1xf32, #tpu.memory_space<vmem>>, %arg4: memref<3x1x128xf32, #tpu.memory_space<vmem>>, %arg5: memref<8x128xf32, #tpu.memory_space<vmem>>) attributes {dimension_semantics = [], scalar_prefetch = 0 : i64, scratch_operands = 0 : i64, tpu.core_type = #tpu.core_type<tc>} {
    %c0 = arith.constant 0 : index
    %c0_0 = arith.constant 0 : index
    %c0_1 = arith.constant 0 : index
    %0 = vector.load %arg0[%c0, %c0_0, %c0_1] : memref<3x16x128xf32, #tpu.memory_space<vmem>>, vector<3x16x128xf32>
    %1 = math.absf %0 : vector<3x16x128xf32>
    %2 = arith.mulf %1, %1 : vector<3x16x128xf32>
    %cst = arith.constant dense<0.000000e+00> : vector<3x128xf32>
    %3 = vector.multi_reduction <add>, %1, %cst [1] : vector<3x16x128xf32> to vector<3x128xf32>
    %4 = vector.shape_cast %3 : vector<3x128xf32> to vector<3x1x128xf32>
    %cst_2 = arith.constant dense<0.000000e+00> : vector<3x128xf32>
    %5 = vector.multi_reduction <add>, %2, %cst_2 [1] : vector<3x16x128xf32> to vector<3x128xf32>
    %6 = vector.shape_cast %5 : vector<3x128xf32> to vector<3x1x128xf32>
    %7 = vector.shape_cast %6 : vector<3x1x128xf32> to vector<1x3x1x128xf32>
    %cst_3 = arith.constant dense<0.000000e+00> : vector<1xf32>
    %8 = vector.multi_reduction <add>, %7, %cst_3 [1, 2, 3] : vector<1x3x1x128xf32> to vector<1xf32>
    %9 = vector.shape_cast %8 : vector<1xf32> to vector<1x1x1x1xf32>
    %10 = vector.extract %9[0, 0, 0, 0] : f32 from vector<1x1x1x1xf32>
    %11 = arith.mulf %4, %4 : vector<3x1x128xf32>
    %12 = vector.shape_cast %11 : vector<3x1x128xf32> to vector<1x3x1x128xf32>
    %cst_4 = arith.constant dense<0.000000e+00> : vector<1xf32>
    %13 = vector.multi_reduction <add>, %12, %cst_4 [1, 2, 3] : vector<1x3x1x128xf32> to vector<1xf32>
    %14 = vector.shape_cast %13 : vector<1xf32> to vector<1x1x1x1xf32>
    %15 = vector.extract %14[0, 0, 0, 0] : f32 from vector<1x1x1x1xf32>
    %cst_5 = arith.constant 0.111111112 : f32
    %16 = arith.mulf %15, %cst_5 : f32
    %17 = arith.subf %10, %16 : f32
    %cst_6 = arith.constant 1.250000e-01 : f32
    %18 = arith.mulf %17, %cst_6 : f32
    %cst_7 = arith.constant dense<0.000000e+00> : vector<3x16xf32>
    %19 = vector.multi_reduction <add>, %1, %cst_7 [2] : vector<3x16x128xf32> to vector<3x16xf32>
    %20 = vector.shape_cast %19 : vector<3x16xf32> to vector<3x16x1xf32>
    %c0_8 = arith.constant 0 : index
    %c0_9 = arith.constant 0 : index
    %c0_10 = arith.constant 0 : index
    %21 = vector.load %arg2[%c0_8, %c0_9, %c0_10] : memref<3x1x128xf32, #tpu.memory_space<vmem>>, vector<3x1x128xf32>
    %22 = arith.mulf %6, %21 : vector<3x1x128xf32>
    %23 = vector.shape_cast %22 : vector<3x1x128xf32> to vector<1x3x1x128xf32>
    %cst_11 = arith.constant dense<0.000000e+00> : vector<1xf32>
    %24 = vector.multi_reduction <add>, %23, %cst_11 [1, 2, 3] : vector<1x3x1x128xf32> to vector<1xf32>
    %25 = vector.shape_cast %24 : vector<1xf32> to vector<1x1x1x1xf32>
    %26 = vector.extract %25[0, 0, 0, 0] : f32 from vector<1x1x1x1xf32>
    %27 = arith.mulf %20, %20 : vector<3x16x1xf32>
    %c0_12 = arith.constant 0 : index
    %c0_13 = arith.constant 0 : index
    %c0_14 = arith.constant 0 : index
    %28 = vector.load %arg3[%c0_12, %c0_13, %c0_14] : memref<3x16x1xf32, #tpu.memory_space<vmem>>, vector<3x16x1xf32>
    %29 = arith.mulf %27, %28 : vector<3x16x1xf32>
    %30 = vector.shape_cast %29 : vector<3x16x1xf32> to vector<1x3x16x1xf32>
    %cst_15 = arith.constant dense<0.000000e+00> : vector<1xf32>
    %31 = vector.multi_reduction <add>, %30, %cst_15 [1, 2, 3] : vector<1x3x16x1xf32> to vector<1xf32>
    %32 = vector.shape_cast %31 : vector<1xf32> to vector<1x1x1x1xf32>
    %33 = vector.extract %32[0, 0, 0, 0] : f32 from vector<1x1x1x1xf32>
    %34 = arith.subf %26, %33 : f32
    %c0_16 = arith.constant 0 : index
    %c0_17 = arith.constant 0 : index
    %c0_18 = arith.constant 0 : index
    %35 = vector.load %arg1[%c0_16, %c0_17, %c0_18] : memref<3x1x128xf32, #tpu.memory_space<vmem>>, vector<3x1x128xf32>
    %36 = vector.broadcast %35 : vector<3x1x128xf32> to vector<3x16x128xf32>
    %37 = arith.cmpf olt, %1, %36 : vector<3x16x128xf32>
    %cst_19 = arith.constant 0.000000e+00 : f32
    %38 = vector.broadcast %cst_19 : f32 to vector<3x16x128xf32>
    %39 = arith.select %37, %1, %38 : vector<3x16x128xi1>, vector<3x16x128xf32>
    %cst_20 = arith.constant dense<0.000000e+00> : vector<3x128xf32>
    %40 = vector.multi_reduction <add>, %39, %cst_20 [1] : vector<3x16x128xf32> to vector<3x128xf32>
    %41 = vector.shape_cast %40 : vector<3x128xf32> to vector<3x1x128xf32>
    %c0_21 = arith.constant 0 : index
    %c0_22 = arith.constant 0 : index
    %c0_23 = arith.constant 0 : index
    %42 = vector.load %arg4[%c0_21, %c0_22, %c0_23] : memref<3x1x128xf32, #tpu.memory_space<vmem>>, vector<3x1x128xf32>
    %43 = arith.mulf %41, %42 : vector<3x1x128xf32>
    %44 = vector.shape_cast %43 : vector<3x1x128xf32> to vector<1x3x1x128xf32>
    %cst_24 = arith.constant dense<0.000000e+00> : vector<1xf32>
    %45 = vector.multi_reduction <add>, %44, %cst_24 [1, 2, 3] : vector<1x3x1x128xf32> to vector<1xf32>
    %46 = vector.shape_cast %45 : vector<1xf32> to vector<1x1x1x1xf32>
    %47 = vector.extract %46[0, 0, 0, 0] : f32 from vector<1x1x1x1xf32>
    %48 = tpu.iota {dimensions = array<i32: 1>} : vector<8x128xi32>
    %49 = tpu.iota {dimensions = array<i32: 0>} : vector<8x128xi32>
    %c0_i32 = arith.constant 0 : i32
    %50 = vector.broadcast %c0_i32 : i32 to vector<8x128xi32>
    %51 = arith.cmpi eq, %49, %50 : vector<8x128xi32>
    %c0_i32_25 = arith.constant 0 : i32
    %52 = vector.broadcast %c0_i32_25 : i32 to vector<8x128xi32>
    %53 = arith.cmpi eq, %48, %52 : vector<8x128xi32>
    %54 = arith.andi %51, %53 : vector<8x128xi1>
    %cst_26 = arith.constant 0.000000e+00 : f32
    %55 = vector.broadcast %18 : f32 to vector<8x128xf32>
    %56 = vector.broadcast %cst_26 : f32 to vector<8x128xf32>
    %57 = arith.select %54, %55, %56 : vector<8x128xi1>, vector<8x128xf32>
    %c1_i32 = arith.constant 1 : i32
    %58 = vector.broadcast %c1_i32 : i32 to vector<8x128xi32>
    %59 = arith.cmpi eq, %48, %58 : vector<8x128xi32>
    %60 = arith.andi %51, %59 : vector<8x128xi1>
    %cst_27 = arith.constant 0.000000e+00 : f32
    %61 = vector.broadcast %34 : f32 to vector<8x128xf32>
    %62 = vector.broadcast %cst_27 : f32 to vector<8x128xf32>
    %63 = arith.select %60, %61, %62 : vector<8x128xi1>, vector<8x128xf32>
    %64 = arith.addf %57, %63 : vector<8x128xf32>
    %c2_i32 = arith.constant 2 : i32
    %65 = vector.broadcast %c2_i32 : i32 to vector<8x128xi32>
    %66 = arith.cmpi eq, %48, %65 : vector<8x128xi32>
    %67 = arith.andi %51, %66 : vector<8x128xi1>
    %cst_28 = arith.constant 0.000000e+00 : f32
    %68 = vector.broadcast %47 : f32 to vector<8x128xf32>
    %69 = vector.broadcast %cst_28 : f32 to vector<8x128xf32>
    %70 = arith.select %67, %68, %69 : vector<8x128xi1>, vector<8x128xf32>
    %71 = arith.addf %64, %70 : vector<8x128xf32>
    %c0_29 = arith.constant 0 : index
    %c0_30 = arith.constant 0 : index
    %72 = vector.load %arg5[%c0_29, %c0_30] : memref<8x128xf32, #tpu.memory_space<vmem>>, vector<8x128xf32>
    tpu.vector_store %arg5[%c0_29, %c0_30], %71 {strides = array<i32>} : memref<8x128xf32, #tpu.memory_space<vmem>>, vector<8x128xf32>,
    return
  }
}

</mosaic_0001>

<bundles_post_ra>
// kernel: tpu_custom_call.1
= control target key start
LH: loop header
LB: loop body
LE: loop exit
PB: predicated region body
PF: predicated region fallthrough
CT: control target
= control target key end

     0   :  { %10 = vsyncpa [#allocation3], 0  ;;  %s541_s0 = inlined_call_operand.vmem [shape: f32[3,16,128], index: 0, kind: input, shape index: {}]   ;;  %s542_s1 = inlined_call_operand.vmem [shape: f32[3,1,128], index: 1, kind: input, shape index: {}]   ;;  %s543_s2 = inlined_call_operand.hbm [shape: f32[3,1,128], index: 2, kind: input, shape index: {}]   ;;  %s544_s3 = inlined_call_operand.vmem [shape: f32[3,16,1], index: 3, kind: input, shape index: {}]   ;;  %s545_s4 = inlined_call_operand.vmem [shape: f32[3,1,128], index: 4, kind: input, shape index: {}]   ;;  %s546_s5 = inlined_call_operand.hbm [shape: f32[8,128], index: 5, kind: output, shape index: {}]  }
   0x1   :  { %11 = vsyncpa [#allocation4], 0  ;;  %s20_s20 = sshll.u32 %s543_s2, 4  ;;  %s375_s21 = smov [#allocation2]   ;;  %s21_s20 = int_to_ptr.hbm [resolvable:$true] %s20_s20 }
   0x2   :  { %s22_s22 = sshll.u32 %s375_s21, 4  ;;  %s376_s23 = smov 16   ;;  %s23_s22 = int_to_ptr.vmem [resolvable:$true] %s22_s22 }
   0x3   :  { %s377_s24 = smov 1  }
   0x4   :  { %28 = dma.hbm_to_vmem [thread:$0]  %s21_s20, 48, %s23_s22, [#allocation3], %s376_s23, %s376_s23, %s377_s24  }
   0x5   :  { %371 = dma.done.wait [#allocation3], 48  }
   0x6   :  { %372 = vsyncadd [#allocation3], 4294967248  ;;  %v37_v0 = vld [vmem:[%s541_s0] sm:$0xff]  ;;  %v39_v1 = vld [vmem:[%s541_s0 + $0x10] sm:$0xff]  ;;  %vm97_vm3 = vcmask 1040384   ;;  %vm182_vm7 = vcmask 7168  }
   0x7   :  { %v41_v2 = vld [vmem:[%s541_s0 + $0x20] sm:$0xff]  ;;  %v421_v3 = vand.u32 2147483647, %v37_v0  ;;  %v423_v4 = vand.u32 2147483647, %v39_v1  ;;  %v38_v6 = vld [vmem:[%s541_s0 + $0x8] sm:$0xff] }
   0x8   :  { %v425_v5 = vand.u32 2147483647, %v41_v2  ;;  %v40_v7 = vld [vmem:[%s541_s0 + $0x18] sm:$0xff]  ;;  %v42_v8 = vld [vmem:[%s541_s0 + $0x28] sm:$0xff]  ;;  %v439_v9 = vand.u32 2147483647, %v38_v6 }
   0x9   :  { %132 = vadd.xlane.f32.xlu0 %v421_v3  ;;  %136 = vadd.xlane.f32.xlu1 %v423_v4  ;;  %v441_v10 = vand.u32 2147483647, %v40_v7  ;;  %v443_v11 = vand.u32 2147483647, %v42_v8  ;;  %v49_v14 = vmul.f32 %v421_v3, %v421_v3  ;;  %v51_v16 = vmul.f32 %v423_v4, %v423_v4  ;;  %v320_v46 = vld [vmem:[%s542_s1] ss:$0 sm:$0xff] }
   0xa   :  { %140 = vadd.xlane.f32.xlu2 %v425_v5  ;;  %v55_v12 = vadd.f32 %v439_v9, %v421_v3  ;;  %v50_v15 = vmul.f32 %v439_v9, %v439_v9  ;;  %v53_v21 = vmul.f32 %v425_v5, %v425_v5  ;;  %v321_v47 = vld [vmem:[%s542_s1 + $0x1] ss:$0 sm:$0xff]  ;;  %vm216_vm0 = vcmp.lt.f32.partialorder %v421_v3, %v320_v46  ;;  %v322_v60 = vld [vmem:[%s542_s1 + $0x2] ss:$0 sm:$0xff]  ;;  %s378_s13 = smov [#allocation5]   ;;  %s296_s16 = sshll.u32 %s546_s5, 4  ;;  %s297_s16 = int_to_ptr.hbm [resolvable:$true] %s296_s16 }
   0xb   :  { %v62_v13 = vadd.f32 %v441_v10, %v423_v4  ;;  %v52_v17 = vmul.f32 %v441_v10, %v441_v10  ;;  %v69_v20 = vadd.f32 %v443_v11, %v425_v5  ;;  %v54_v22 = vmul.f32 %v443_v11, %v443_v11  ;;  %s294_s14 = sshll.u32 %s378_s13, 4  ;;  %s295_s14 = int_to_ptr.vmem [resolvable:$true] %s294_s14 }
   0xc   :  { %v56_v18 = vrot.slane %v55_v12, 4  ;;  %v76_v23 = vadd.f32 %v50_v15, %v49_v14  ;;  %vm217_vm1 = vcmp.lt.f32.partialorder %v439_v9, %v320_v46  ;;  %vm218_vm2 = vcmp.lt.f32.partialorder %v423_v4, %v321_v47 }
   0xd   :  { %v63_v19 = vrot.slane %v62_v13, 4  ;;  %v83_v24 = vadd.f32 %v52_v17, %v51_v16  ;;  %v70_v27 = vrot.slane %v69_v20, 4  ;;  %v90_v30 = vadd.f32 %v54_v22, %v53_v21 }
   0xe   :  { %v57_v25 = vadd.f32 %v56_v18, %v55_v12  ;;  %v77_v28 = vrot.slane %v76_v23, 4  ;;  %vm219_vm4 = vcmp.lt.f32.partialorder %v441_v10, %v321_v47  ;;  %vm220_vm5 = vcmp.lt.f32.partialorder %v425_v5, %v322_v60  ;;  %v249_v47 = vld [vmem:[%s545_s4] sm:$0x1] }
   0xf   :  { %v64_v26 = vadd.f32 %v63_v19, %v62_v13  ;;  %v84_v29 = vrot.slane %v83_v24, 4  ;;  %v71_v33 = vadd.f32 %v70_v27, %v69_v20  ;;  %v91_v36 = vrot.slane %v90_v30, 4  ;;  %v145_v27 = vld [vmem:[#allocation2 + $0x1] sm:$0x1] }
  0x10   :  { %v58_v31 = vrot.slane %v57_v25, 2  ;;  %v78_v34 = vadd.f32 %v77_v28, %v76_v23  ;;  %vm221_vm6 = vcmp.lt.f32.partialorder %v443_v11, %v322_v60  ;;  %v222_v17 = vsel %vm216_vm0, %v421_v3, 0.0 }
  0x11   :  { %134 = vadd.xlane.f32.xlu0 %v439_v9  ;;  %138 = vadd.xlane.f32.xlu1 %v441_v10  ;;  %v65_v32 = vrot.slane %v64_v26, 2  ;;  %v85_v35 = vadd.f32 %v84_v29, %v83_v24  ;;  %v72_v39 = vrot.slane %v71_v33, 2  ;;  %v92_v42 = vadd.f32 %v91_v36, %v90_v30 }
  0x12   :  { %142 = vadd.xlane.f32.xlu2 %v443_v11  ;;  %v59_v37 = vadd.f32 %v58_v31, %v57_v25  ;;  %v79_v40 = vrot.slane %v78_v34, 2  ;;  %v223_v18 = vsel %vm217_vm1, %v439_v9, 0.0  ;;  %v224_v20 = vsel %vm218_vm2, %v423_v4, 0.0 }
  0x13   :  { %v66_v38 = vadd.f32 %v65_v32, %v64_v26  ;;  %v86_v41 = vrot.slane %v85_v35, 2  ;;  %v73_v45 = vadd.f32 %v72_v39, %v71_v33  ;;  %v93_v50 = vrot.slane %v92_v42, 2  ;;  %v144_v26 = vld [vmem:[#allocation2] sm:$0x1]  ;;  %v146_v32 = vld [vmem:[#allocation2 + $0x2] sm:$0x1] }
  0x14   :  { %v60_v43 = vrot.slane %v59_v37, 1  ;;  %v80_v48 = vadd.f32 %v79_v40, %v78_v34  ;;  %v225_v21 = vsel %vm219_vm4, %v441_v10, 0.0  ;;  %v226_v22 = vsel %vm220_vm5, %v425_v5, 0.0 }
  0x15   :  { %v67_v44 = vrot.slane %v66_v38, 1  ;;  %v87_v49 = vadd.f32 %v86_v41, %v85_v35  ;;  %v74_v53 = vrot.slane %v73_v45, 1  ;;  %v94_v56 = vadd.f32 %v93_v50, %v92_v42 }
  0x16   :  { %v61_v51 = vadd.f32 %v60_v43, %v59_v37  ;;  %v81_v54 = vrot.slane %v80_v48, 1  ;;  %v227_v23 = vsel %vm221_vm6, %v443_v11, 0.0  ;;  %v228_v24 = vadd.f32 %v223_v18, %v222_v17 }
  0x17   :  { %v68_v52 = vadd.f32 %v67_v44, %v66_v38  ;;  %v88_v55 = vrot.slane %v87_v49, 1  ;;  %v75_v57 = vadd.f32 %v74_v53, %v73_v45  ;;  %v95_v63 = vrot.slane %v94_v56, 1 }
  0x18   :  { %v112_v58 = vmul.f32 %v61_v51, %v61_v51  ;;  %v82_v61 = vadd.f32 %v81_v54, %v80_v48  ;;  %v235_v25 = vadd.f32 %v225_v21, %v224_v20  ;;  %v242_v3 = vadd.f32 %v227_v23, %v226_v22  ;;  %v250_v48 = vld [vmem:[%s545_s4 + $0x1] sm:$0x1]  ;;  %v251_v51 = vld [vmem:[%s545_s4 + $0x2] sm:$0x1] }
  0x19   :  { %v113_v59 = vmul.f32 %v68_v52, %v68_v52  ;;  %v89_v62 = vadd.f32 %v88_v55, %v87_v49  ;;  %v114_v0 = vmul.f32 %v75_v57, %v75_v57  ;;  %v96_v7 = vadd.f32 %v95_v63, %v94_v56  ;;  %v174_v23 = vld [vmem:[%s544_s3 + $0x20] sm:$0xff] }
  0x1a   :  { %v115_v1 = vsel %vm97_vm3, %v112_v58, 0.0  ;;  %v98_v8 = vsel %vm97_vm3, %v82_v61, 0.0  ;;  %v229_v28 = vrot.slane %v228_v24, 4  ;;  %v236_v9 = vrot.slane %v235_v25, 4 }
  0x1b   :  { %v116_v2 = vsel %vm97_vm3, %v113_v59, 0.0  ;;  %v99_v12 = vsel %vm97_vm3, %v89_v62, 0.0  ;;  %v118_v13 = vsel %vm97_vm3, %v114_v0, 0.0  ;;  %v101_v16 = vsel %vm97_vm3, %v96_v7, 0.0 }
  0x1c   :  { %v117_v6 = vadd.f32 %v116_v2, %v115_v1  ;;  %v100_v14 = vadd.f32 %v99_v12, %v98_v8  ;;  %v147_v29 = vmul.f32 %v144_v26, %v82_v61  ;;  %v148_v30 = vmul.f32 %v145_v27, %v89_v62  ;;  %v170_v1 = vld [vmem:[%s544_s3] sm:$0xff]  ;;  %v173_v12 = vld [vmem:[%s544_s3 + $0x18] sm:$0xff] }
  0x1d   :  { %v243_v31 = vrot.slane %v242_v3, 4  ;;  %v230_v4 = vadd.f32 %v229_v28, %v228_v24  ;;  %v237_v33 = vadd.f32 %v236_v9, %v235_v25  ;;  %v149_v10 = vmul.f32 %v146_v32, %v96_v7  ;;  %v171_v7 = vld [vmem:[%s544_s3 + $0x8] sm:$0xff] }
  0x1e   :  { %v119_v15 = vadd.f32 %v118_v13, %v117_v6  ;;  %v102_v19 = vadd.f32 %v101_v16, %v100_v14  ;;  %v150_v5 = vsel %vm97_vm3, %v147_v29, 0.0  ;;  %v151_v34 = vsel %vm97_vm3, %v148_v30, 0.0  ;;  %v172_v6 = vld [vmem:[%s544_s3 + $0x10] sm:$0xff]  ;;  %v175_v24 = vld [vmem:[%s544_s3 + $0x28] sm:$0xff] }
  0x1f   :  { %v244_v11 = vadd.f32 %v243_v31, %v242_v3  ;;  %v152_v35 = vadd.f32 %v151_v34, %v150_v5  ;;  %v231_v36 = vrot.slane %v230_v4, 2  ;;  %v238_v37 = vrot.slane %v237_v33, 2 }
  0x20   :  { %120 = vadd.xlane.f32.xlu1 %v119_v15  ;;  %103 = vadd.xlane.f32.xlu0 %v102_v19  ;;  %v153_v38 = vsel %vm97_vm3, %v149_v10, 0.0 }
  0x21   :  { %v245_v39 = vrot.slane %v244_v11, 2  ;;  %v154_v40 = vadd.f32 %v153_v38, %v152_v35  ;;  %v232_v41 = vadd.f32 %v231_v36, %v230_v4  ;;  %v239_v42 = vadd.f32 %v238_v37, %v237_v33 }
  0x23   :  { %v246_v43 = vadd.f32 %v245_v39, %v244_v11  ;;  %155 = vadd.xlane.f32.xlu2 %v154_v40  ;;  %v233_v44 = vrot.slane %v232_v41, 1  ;;  %v240_v45 = vrot.slane %v239_v42, 1 }
  0x25   :  { %v247_v46 = vrot.slane %v246_v43, 1  ;;  %v234_v49 = vadd.f32 %v233_v44, %v232_v41  ;;  %v241_v50 = vadd.f32 %v240_v45, %v239_v42 }
  0x27   :  { %v248_v52 = vadd.f32 %v247_v46, %v246_v43  ;;  %v252_v53 = vmul.f32 %v249_v47, %v234_v49  ;;  %v253_v54 = vmul.f32 %v250_v48, %v241_v50 }
  0x29   :  { %v254_v55 = vmul.f32 %v251_v51, %v248_v52  ;;  %v255_v56 = vsel %vm97_vm3, %v252_v53, 0.0  ;;  %v256_v57 = vsel %vm97_vm3, %v253_v54, 0.0 }
  0x2a   :  { %v257_v58 = vadd.f32 %v256_v57, %v255_v56 }
  0x2b   :  { %v258_v59 = vsel %vm97_vm3, %v254_v55, 0.0 }
  0x2c   :  { %v259_v60 = vadd.f32 %v258_v59, %v257_v58 }
  0x2e   :  { %260 = vadd.xlane.f32.xlu1 %v259_v60 }
  0x7c   :  { %v133_v61 = vpop.xlane.xlu0 %132  ;;  %v137_v62 = vpop.xlane.xlu1 %136 }
  0x7d   :  { %v141_v63 = vpop.xlane.xlu2 %140  ;;  %v164_v0 = vmul.f32 %v133_v61, %v133_v61  ;;  %v166_v2 = vmul.f32 %v137_v62, %v137_v62 }
  0x7e   :  { %v168_v18 = vmul.f32 %v141_v63, %v141_v63 }
  0x7f   :  { %v176_v14 = vmul.f32 %v170_v1, %v164_v0  ;;  %v178_v19 = vmul.f32 %v172_v6, %v166_v2  ;;  %v269_v6 = vlaneseq }
  0x80   :  { %v180_v28 = vmul.f32 %v174_v23, %v168_v18 }
  0x81   :  { %v183_v25 = vsel %vm182_vm7, %v176_v14, 0.0  ;;  %v186_v27 = vsel %vm182_vm7, %v178_v19, 0.0 }
  0x82   :  { %v190_v32 = vsel %vm182_vm7, %v180_v28, 0.0 }
  0x84   :  { %v135_v8 = vpop.xlane.xlu0 %134  ;;  %v139_v13 = vpop.xlane.xlu1 %138 }
  0x85   :  { %v165_v15 = vmul.f32 %v135_v8, %v135_v8  ;;  %v167_v16 = vmul.f32 %v139_v13, %v139_v13  ;;  %v143_v17 = vpop.xlane.xlu2 %142  ;;  %v272_v8 = vshrl.u32 %v269_v6, 7 }
  0x86   :  { %v169_v22 = vmul.f32 %v143_v17, %v143_v17 }
  0x87   :  { %v177_v20 = vmul.f32 %v171_v7, %v165_v15  ;;  %v179_v21 = vmul.f32 %v173_v12, %v167_v16  ;;  %v270_v7 = vand.u32 127, %v269_v6  ;;  %vm273_vm8 = vcmp.eq.s32.totalorder %v272_v8, 0 }
  0x88   :  { %v181_v29 = vmul.f32 %v175_v24, %v169_v22 }
  0x89   :  { %v184_v3 = vsel %vm182_vm7, %v177_v20, 0.0  ;;  %v188_v9 = vsel %vm182_vm7, %v179_v21, 0.0  ;;  %vm274_vm9 = vcmp.eq.s32.totalorder %v270_v7, 0  ;;  %vm278_vm10 = vcmp.eq.s32.totalorder %v270_v7, 1 }
  0x8a   :  { %v185_v26 = vadd.f32 %v184_v3, %v183_v25  ;;  %v192_v4 = vsel %vm182_vm7, %v181_v29, 0.0  ;;  %vm275_vm11 = vmand %vm273_vm8, %vm274_vm9  ;;  %vm283_vm12 = vcmp.eq.s32.totalorder %v270_v7, 2 }
  0x8b   :  { %vm279_vm13 = vmand %vm273_vm8, %vm278_vm10 }
  0x8c   :  { %v187_v30 = vadd.f32 %v186_v27, %v185_v26  ;;  %vm284_vm14 = vmand %vm273_vm8, %vm283_vm12 }
  0x8e   :  { %v189_v31 = vadd.f32 %v188_v9, %v187_v30 }
  0x90   :  { %v191_v33 = vadd.f32 %v190_v32, %v189_v31 }
  0x92   :  { %v193_v10 = vadd.f32 %v192_v4, %v191_v33 }
  0x93   :  { %v121_v5 = vpop.xlane.xlu1 %120  ;;  %v104_v11 = vpop.xlane.xlu0 %103 }
  0x94   :  { %194 = vadd.xlane.f32.xlu0 %v193_v10  ;;  %v122_v34 = vrot.slane %v121_v5, 4  ;;  %v105_v35 = vrot.slane %v104_v11, 4 }
  0x96   :  { %v123_v36 = vadd.f32 %v122_v34, %v121_v5  ;;  %v106_v37 = vadd.f32 %v105_v35, %v104_v11  ;;  %v156_v43 = vpop.xlane.xlu2 %155 }
  0x97   :  { %v157_v45 = vrot.slane %v156_v43, 4 }
  0x98   :  { %v124_v38 = vrot.slane %v123_v36, 2  ;;  %v107_v39 = vrot.slane %v106_v37, 2 }
  0x99   :  { %v158_v48 = vadd.f32 %v157_v45, %v156_v43 }
  0x9a   :  { %v125_v40 = vadd.f32 %v124_v38, %v123_v36  ;;  %v108_v41 = vadd.f32 %v107_v39, %v106_v37 }
  0x9b   :  { %v159_v49 = vrot.slane %v158_v48, 2 }
  0x9c   :  { %v126_v42 = vrot.slane %v125_v40, 1  ;;  %v109_v44 = vrot.slane %v108_v41, 1 }
  0x9d   :  { %v160_v50 = vadd.f32 %v159_v49, %v158_v48 }
  0x9e   :  { %v127_v46 = vadd.f32 %v126_v42, %v125_v40  ;;  %v110_v47 = vadd.f32 %v109_v44, %v108_v41 }
  0x9f   :  { %v161_v51 = vrot.slane %v160_v50, 1 }
  0xa0   :  { %306 = vpush %v110_v47 }
  0xa1   :  { %308 = vpush %v127_v46  ;;  %v162_v52 = vadd.f32 %v161_v51, %v160_v50  ;;  %v261_v53 = vpop.xlane.xlu1 %260 }
  0xa2   :  { %v262_v54 = vrot.slane %v261_v53, 4 }
  0xa3   :  { %310 = vpush %v162_v52 }
  0xa4   :  { %v263_v55 = vadd.f32 %v262_v54, %v261_v53 }
  0xa6   :  { %v264_v56 = vrot.slane %v263_v55, 2 }
  0xa8   :  { %v265_v60 = vadd.f32 %v264_v56, %v263_v55 }
  0xaa   :  { %v266_v63 = vrot.slane %v265_v60, 1 }
  0xac   :  { %v267_v2 = vadd.f32 %v266_v63, %v265_v60 }
  0xd1   :  { %s307_s3 = spop %306 }
  0xd2   :  { %s309_s6 = spop %308 }
  0xd3   :  { %s129_s7 = smul.f32 0.11111111, %s309_s6 }
  0xd4   :  { %s311_s10 = spop %310 }
  0xd5   :  { %s130_s8 = ssub.f32 %s307_s3, %s129_s7 }
  0xd7   :  { %s131_s9 = smul.f32 0.125, %s130_s8 }
  0xd9   :  { %v276_v12 = vstv %s131_s9 }
  0xda   :  { %v277_v15 = vsel %vm275_vm11, %v276_v12, 0.0 }
 0x107   :  { %v195_v57 = vpop.xlane.xlu0 %194 }
 0x108   :  { %v196_v58 = vrot.slane %v195_v57, 4 }
 0x10a   :  { %v197_v59 = vadd.f32 %v196_v58, %v195_v57 }
 0x10c   :  { %v198_v61 = vrot.slane %v197_v59, 2 }
 0x10e   :  { %v199_v62 = vadd.f32 %v198_v61, %v197_v59 }
 0x110   :  { %v200_v0 = vrot.slane %v199_v62, 1 }
 0x112   :  { %v201_v1 = vadd.f32 %v200_v0, %v199_v62 }
 0x114   :  { %312 = vpush %v201_v1 }
 0x115   :  { %314 = vpush %v267_v2 }
 0x145   :  { %s313_s0 = spop %312 }
 0x146   :  { %s203_s11 = ssub.f32 %s311_s10, %s313_s0  ;;  %s315_s12 = spop %314 }
 0x147   :  { %v285_v14 = vstv %s315_s12 }
 0x148   :  { %v280_v13 = vstv %s203_s11  ;;  %v286_v18 = vsel %vm284_vm14, %v285_v14, 0.0 }
 0x149   :  { %v281_v16 = vsel %vm279_vm13, %v280_v13, 0.0 }
 0x14a   :  { %v282_v17 = vadd.f32 %v281_v16, %v277_v15 }
 0x14c   :  { %v287_v19 = vadd.f32 %v286_v18, %v282_v17 }
 0x14e   :  { %288 = vst [vmem:[#allocation5] sm:$0xff] %v287_v19 }
 0x14f   :  { %299 = dma.vmem_to_hbm [thread:$0]  %s295_s14, 128, %s297_s16, [#allocation4]  }
 0x150   :  { %373 = dma.done.wait [#allocation4], 128  }
 0x151   :  { %374 = vsyncadd [#allocation4], 4294967168 }
 0x152   :  { %304 = vsyncpa [#allocation3], 1 }
 0x153   :  { %305 = vsyncpa [#allocation4], 1 }

</bundles_post_ra>
